<compile_context>
chip_gen: v7x
topology: tpu7x:2x2x1
jax: 0.10.0
libtpu: 0.0.40
codegen_flags: <defaults>
</compile_context>

<pallas_src>
import jax
import jax.numpy as jnp
from jax.experimental import pallas as pl
from jax.experimental.pallas import tpu as pltpu


def _prompt_kernel(x_ref, cls_pos0_ref, pos_rest_ref, o_ref):
    # x_ref:        (Bt, C, HW)    conv1 features, channel-major (no host transpose)
    # cls_pos0_ref: (1, C)         class_embedding + positional_embedding[0]
    # pos_rest_ref: (HW, C)        positional_embedding[1:]
    # o_ref:        (Bt, HW+1, C)  output tokens
    bt = o_ref.shape[0]
    c = cls_pos0_ref.shape[-1]

    # Fused transpose (XLU) of the whole batch tile + positional add (VPU).
    x_t = jnp.transpose(x_ref[...], (0, 2, 1))            # (Bt, HW, C)
    tokens = x_t + pos_rest_ref[...][None, :, :]           # (Bt, HW, C)

    # Class-token row broadcast across the batch tile.
    cls_blk = jnp.broadcast_to(cls_pos0_ref[...][None, :, :], (bt, 1, c))

    # Build the full block in registers and issue ONE aligned full-tile store
    # (avoids bt masked 1-row stores and +1-sublane-offset vst.msk pairs).
    o_ref[...] = jnp.concatenate([cls_blk, tokens], axis=1)


def _vmem_config():
    """Pick (budget, limit) bytes per chip generation; conservative fallback."""
    try:
        kind = jax.devices()[0].device_kind.lower()
    except Exception:  # pragma: no cover - e.g. interpret mode
        kind = ""
    if "v7" in kind:
        # v7x: 64 MiB VMEM per TensorCore -> keep headroom for relayout scratch.
        return 24 * 1024 * 1024, 32 * 1024 * 1024
    # v5e / v6e: 128 MiB physical VMEM -> bigger blocks amortize per-step overhead.
    return 56 * 1024 * 1024, 96 * 1024 * 1024


def _two_tensorcores():
    try:
        return "v7" in jax.devices()[0].device_kind.lower()
    except Exception:  # pragma: no cover
        return False


def _pick_bt(B, per_b_bytes, const_bytes, budget_bytes, want_even_grid):
    """Largest divisor of B whose double-buffered in+out blocks fit the budget.

    If `want_even_grid` (v7x, 2 TensorCores) prefer a divisor giving an even
    number of grid steps so both cores get equal work.
    """
    cap = max(1, int((budget_bytes // 2 - const_bytes) // per_b_bytes))
    divisors = [d for d in range(1, B + 1) if B % d == 0 and d <= cap]
    if not divisors:
        divisors = [1]
    bt = max(divisors)
    if want_even_grid and (B // bt) % 2 != 0:
        even = [d for d in divisors if (B // d) % 2 == 0]
        if even:
            bt = max(even)
    return bt


def vision_prompt_forward(x_nchw, class_embedding, positional_embedding, ctx,
                          *, expand_ctx=False):
    B, C, H, W = x_nchw.shape
    HW = H * W
    dtype = x_nchw.dtype

    # Free, contiguous reshape only -- the permute to token-major happens in-kernel.
    x_cm = x_nchw.reshape(B, C, HW)

    # Batch-invariant prep (tiny): precombined class row + aligned pos tail.
    # Cast-then-add matches CLIP's `class_embedding.to(x.dtype)` + pos.type(dtype).
    cls_pos0 = (class_embedding.astype(dtype)
                + positional_embedding[0].astype(dtype)).reshape(1, C)
    pos_rest = positional_embedding[1:].astype(dtype)

    budget_bytes, limit_bytes = _vmem_config()
    itemsize = jnp.dtype(dtype).itemsize
    per_b_bytes = (C * HW + (HW + 1) * C) * itemsize       # in block + out block per elem
    const_bytes = ((HW + 1) * C + C) * itemsize            # pos_rest + cls row
    bt = _pick_bt(B, per_b_bytes, const_bytes, budget_bytes,
                  want_even_grid=_two_tensorcores())
    grid = (pl.cdiv(B, bt),)   # bt | B, so this is exact (no ragged tail block)

    out = pl.pallas_call(
        _prompt_kernel,
        out_shape=jax.ShapeDtypeStruct((B, HW + 1, C), dtype),
        grid_spec=pl.GridSpec(
            grid=grid,
            in_specs=[
                pl.BlockSpec((bt, C, HW), lambda b: (b, 0, 0)),
                pl.BlockSpec((1, C), lambda b: (0, 0)),
                pl.BlockSpec((HW, C), lambda b: (0, 0)),
            ],
            out_specs=pl.BlockSpec((bt, HW + 1, C), lambda b: (b, 0, 0)),
        ),
        compiler_params=pltpu.CompilerParams(
            dimension_semantics=("parallel",),
            vmem_limit_bytes=limit_bytes,
        ),
    )(x_cm, cls_pos0, pos_rest)

    if expand_ctx:
        # Matches PyTorch's ctx.unsqueeze(0).expand(B, ...) materialized; normally
        # keep expand_ctx=False and broadcast at the consumer (PyTorch .expand is a
        # zero-copy view, so semantics are identical without the extra HBM pass).
        return out, jnp.broadcast_to(ctx[None], (B,) + ctx.shape)
    return out, ctx


if __name__ == "__main__":
    # Small synthetic shapes consistent with the module.
    # B=4 exercises the batch-tiled path; ctx_dim = C = 32; 4x4 grid -> 16 patches.
    B, C, H, W = 4, 32, 4, 4
    n_pro, layer_p = 12, 12
    HW = H * W
    dtype = jnp.float32

    key = jax.random.PRNGKey(0)
    k_x, k_cls, k_pos, k_ctx, k_ctxd = jax.random.split(key, 5)

    # "conv1 output"-shaped input (the module's forward never calls conv1 itself).
    x = jax.random.normal(k_x, (B, C, H, W), dtype=dtype)

    # Parameter init (shapes from __init__; std=0.02 for ctx).
    class_embedding = jax.random.normal(k_cls, (C,), dtype=dtype)
    positional_embedding = jax.random.normal(k_pos, (HW + 1, C), dtype=dtype)
    ctx = 0.02 * jax.random.normal(k_ctx, (layer_p, n_pro, C), dtype=dtype)
    ctx_domain = 0.02 * jax.random.normal(k_ctxd, (layer_p, n_pro, C), dtype=dtype)  # unused in forward

    out_tokens, out_ctx = vision_prompt_forward(
        x, class_embedding, positional_embedding, ctx)
    out_tokens = jax.block_until_ready(out_tokens)
    out_ctx = jax.block_until_ready(out_ctx)

    # Reference check in plain JAX.
    x_seq_ref = jnp.transpose(x.reshape(B, C, HW), (0, 2, 1))
    cls_tok_ref = jnp.broadcast_to(class_embedding.reshape(1, 1, C), (B, 1, C))
    ref_tokens = jnp.concatenate([cls_tok_ref, x_seq_ref], axis=1) + positional_embedding[None]
    ref_ctx = jnp.broadcast_to(ctx[None], (B, layer_p, n_pro, C))

    assert out_tokens.shape == (B, HW + 1, C)
    assert jnp.allclose(out_tokens, ref_tokens, atol=1e-6, rtol=1e-6)
    # ctx is returned unexpanded (zero-copy view semantics); broadcast at consumer.
    assert out_ctx.shape == (layer_p, n_pro, C)
    assert jnp.allclose(jnp.broadcast_to(out_ctx[None], (B,) + out_ctx.shape), ref_ctx)

    print("KERNEL_OK")
</pallas_src>

<mosaic_0001>
module attributes {stable_mosaic.version = 11 : i64} {
  func.func @_prompt_kernel(%arg0: i32, %arg1: memref<4x32x16xf32, #tpu.memory_space<vmem>>, %arg2: memref<1x32xf32, #tpu.memory_space<vmem>>, %arg3: memref<16x32xf32, #tpu.memory_space<vmem>>, %arg4: memref<4x17x32xf32, #tpu.memory_space<vmem>>) attributes {dimension_semantics = [#tpu.dimension_semantics<parallel>], iteration_bounds = array<i64: 1>, scalar_prefetch = 0 : i64, scratch_operands = 0 : i64, tpu.core_type = #tpu.core_type<tc>, window_params = [{transform_indices = @transform_0, window_bounds = array<i64: 4, 32, 16>}, {pipeline_mode = #tpu.pipeline_mode<synchronous>, transform_indices = @transform_1, window_bounds = array<i64: 1, 32>}, {pipeline_mode = #tpu.pipeline_mode<synchronous>, transform_indices = @transform_2, window_bounds = array<i64: 16, 32>}, {transform_indices = @transform_3, window_bounds = array<i64: 4, 17, 32>}]} {
    %c0 = arith.constant 0 : index
    %c0_0 = arith.constant 0 : index
    %c0_1 = arith.constant 0 : index
    %0 = vector.load %arg1[%c0, %c0_0, %c0_1] : memref<4x32x16xf32, #tpu.memory_space<vmem>>, vector<4x32x16xf32>
    %1 = tpu.transpose %0, [0, 2, 1] : vector<4x32x16xf32> -> vector<4x16x32xf32>
    %c0_2 = arith.constant 0 : index
    %c0_3 = arith.constant 0 : index
    %2 = vector.load %arg3[%c0_2, %c0_3] : memref<16x32xf32, #tpu.memory_space<vmem>>, vector<16x32xf32>
    %3 = vector.shape_cast %2 : vector<16x32xf32> to vector<1x16x32xf32>
    %4 = vector.broadcast %3 : vector<1x16x32xf32> to vector<4x16x32xf32>
    %5 = arith.addf %1, %4 : vector<4x16x32xf32>
    %c0_4 = arith.constant 0 : index
    %c0_5 = arith.constant 0 : index
    %6 = vector.load %arg2[%c0_4, %c0_5] : memref<1x32xf32, #tpu.memory_space<vmem>>, vector<1x32xf32>
    %7 = vector.shape_cast %6 : vector<1x32xf32> to vector<1x1x32xf32>
    %8 = vector.shape_cast %7 : vector<1x1x32xf32> to vector<1x1x32xf32>
    %9 = vector.broadcast %8 : vector<1x1x32xf32> to vector<4x1x32xf32>
    %10 = tpu.concatenate %9, %5 in 1 : vector<4x1x32xf32>, vector<4x16x32xf32> -> vector<4x17x32xf32>
    %c0_6 = arith.constant 0 : index
    %c0_7 = arith.constant 0 : index
    %c0_8 = arith.constant 0 : index
    %11 = vector.load %arg4[%c0_6, %c0_7, %c0_8] : memref<4x17x32xf32, #tpu.memory_space<vmem>>, vector<4x17x32xf32>
    tpu.vector_store %arg4[%c0_6, %c0_7, %c0_8], %10 {strides = array<i32>} : memref<4x17x32xf32, #tpu.memory_space<vmem>>, vector<4x17x32xf32>,
    return
  }
  func.func @transform_0(%arg0: i32) -> (i32, i32, i32) {
    %c0_i32 = arith.constant 0 : i32
    %c0_i32_0 = arith.constant 0 : i32
    %c0_i32_1 = arith.constant 0 : i32
    return %arg0, %c0_i32, %c0_i32_0 : i32, i32, i32
  }
  func.func @transform_1(%arg0: i32) -> (i32, i32) {
    %c0_i32 = arith.constant 0 : i32
    %c0_i32_0 = arith.constant 0 : i32
    %c0_i32_1 = arith.constant 0 : i32
    return %c0_i32, %c0_i32_0 : i32, i32
  }
  func.func @transform_2(%arg0: i32) -> (i32, i32) {
    %c0_i32 = arith.constant 0 : i32
    %c0_i32_0 = arith.constant 0 : i32
    %c0_i32_1 = arith.constant 0 : i32
    return %c0_i32, %c0_i32_0 : i32, i32
  }
  func.func @transform_3(%arg0: i32) -> (i32, i32, i32) {
    %c0_i32 = arith.constant 0 : i32
    %c0_i32_0 = arith.constant 0 : i32
    %c0_i32_1 = arith.constant 0 : i32
    return %arg0, %c0_i32, %c0_i32_0 : i32, i32, i32
  }
}

</mosaic_0001>

<bundles_post_ra>
// kernel: tpu_custom_call.1
= control target key start
LH: loop header
LB: loop body
LE: loop exit
PB: predicated region body
PF: predicated region fallthrough
CT: control target
= control target key end

     0   :  { %8 = vsyncpa [#allocation3], 0  ;;  %s489_s0 = inlined_call_operand.hbm [shape: f32[4,32,16], index: 0, kind: input, shape index: {}]   ;;  %s490_s1 = inlined_call_operand.hbm [shape: f32[1,32], index: 1, kind: input, shape index: {}]   ;;  %s491_s2 = inlined_call_operand.hbm [shape: f32[16,32], index: 2, kind: input, shape index: {}]   ;;  %s492_s3 = inlined_call_operand.hbm [shape: f32[4,17,32], index: 3, kind: output, shape index: {}]  }
   0x1   :  { %9 = vsyncpa [#allocation6], 0 }
   0x2   :  { %10 = vsyncpa [#allocation4], 0  ;;  %s379_s12 = smov [#allocation5]   ;;  %s380_s14 = smov [#allocation2]  }
   0x3   :  { %s29_s13 = sshll.u32 %s379_s12, 4  ;;  %s16_s15 = sshll.u32 %s380_s14, 4  ;;  %s30_s13 = int_to_ptr.vmem [resolvable:$true] %s29_s13  ;;  %s405_s15 = int_to_ptr.vmem [resolvable:$true] %s16_s15 }
   0x4   :  { %s285_s18 = scalar_lea.hbm %s490_s1, 16 }
   0x5   :  { %p286_p0 = scmp.ne.s32.totalorder %s490_s1, %s285_s18  ;;  %p289_p1 = scmp.lt.u32.totalorder %s285_s18, %s490_s1 }
   0x7   :  { %p291_p2 = pnand %p289_p1, %p286_p0 }
   0x9   :  { %294 = shalt.err (!%p291_p2)
}
   0xa   :  { %s295_s23 = scalar_lea.vmem %s30_s13, 16  ;;  %s299_s24 = scalar_lea.vmem %s30_s13, 32 }
   0xb   :  { %p296_p3 = scmp.ne.s32.totalorder %s30_s13, %s295_s23  ;;  %p300_p4 = scmp.lt.s32.totalorder %s30_s13, %s30_s13 }
   0xc   :  { %p301_p5 = scmp.lt.s32.totalorder %s299_s24, %s295_s23 }
   0xe   :  { %p302_p6 = por %p301_p5, %p300_p4 }
  0x10   :  { %p303_p7 = pnand %p302_p6, %p296_p3 }
  0x12   :  { %306 = shalt.err (!%p303_p7)
}
  0x13   :  { %32 = dma.hbm_to_vmem [thread:$0]  %s490_s1, 16, %s30_s13, [#allocation6]  }
  0x14   :  { %s307_s29 = scalar_lea.hbm %s489_s0, 2048 }
  0x15   :  { %p308_p8 = scmp.ne.s32.totalorder %s489_s0, %s307_s29  ;;  %p311_p9 = scmp.lt.u32.totalorder %s307_s29, %s489_s0 }
  0x17   :  { %p313_p10 = pnand %p311_p9, %p308_p8 }
  0x19   :  { %316 = shalt.err (!%p313_p10)
}
  0x1a   :  { %s317_s7 = scalar_lea.vmem %s405_s15, 2048  ;;  %p322_p12 = scmp.lt.s32.totalorder %s405_s15, %s405_s15 }
  0x1b   :  { %p318_p11 = scmp.ne.s32.totalorder %s405_s15, %s317_s7  ;;  %p323_p13 = scmp.lt.s32.totalorder %s317_s7, %s317_s7 }
  0x1d   :  { %p324_p0 = por %p323_p13, %p322_p12 }
  0x1f   :  { %p325_p1 = pnand %p324_p0, %p318_p11 }
  0x21   :  { %328 = shalt.err (!%p325_p1)
}
  0x22   :  { %s381_s1 = smov 128   ;;  %s382_s8 = smov 8  }
  0x23   :  { %22 = dma.hbm_to_vmem [thread:$0]  %s489_s0, 2048, %s405_s15, [#allocation3], %s381_s1, %s381_s1, %s382_s8  }
  0x24   :  { %s383_s11 = smov [#allocation7]   ;;  %s329_s16 = scalar_lea.hbm %s491_s2, 256 }
  0x25   :  { %s38_s12 = sshll.u32 %s383_s11, 4  ;;  %p330_p2 = scmp.ne.s32.totalorder %s491_s2, %s329_s16  ;;  %s39_s12 = int_to_ptr.vmem [resolvable:$true] %s38_s12 }
  0x26   :  { %p333_p3 = scmp.lt.u32.totalorder %s329_s16, %s491_s2 }
  0x28   :  { %p335_p4 = pnand %p333_p3, %p330_p2 }
  0x2a   :  { %338 = shalt.err (!%p335_p4)
}
  0x2b   :  { %s339_s21 = scalar_lea.vmem %s39_s12, 256  ;;  %p344_p6 = scmp.lt.s32.totalorder %s39_s12, %s39_s12 }
  0x2c   :  { %p340_p5 = scmp.ne.s32.totalorder %s39_s12, %s339_s21  ;;  %p345_p7 = scmp.lt.s32.totalorder %s339_s21, %s339_s21 }
  0x2e   :  { %p346_p8 = por %p345_p7, %p344_p6 }
  0x30   :  { %p347_p9 = pnand %p346_p8, %p340_p5 }
  0x32   :  { %350 = shalt.err (!%p347_p9)
}
  0x33   :  { %44 = dma.hbm_to_vmem [thread:$0]  %s491_s2, 256, %s39_s12, [#allocation6], %s381_s1, %s381_s1, %s382_s8  }
  0x34   :  { %373 = dma.done.wait [#allocation3], 2048  }
  0x35   :  { %374 = vsyncadd [#allocation3], 4294965248 }
  0x36   :  { %375 = dma.done.wait [#allocation6], 272  }
  0x37   :  { %376 = vsyncadd [#allocation6], 4294967024  ;;  %v58_v0 = vld [vmem:[#allocation2 + $0x20] sm:$0xff]  ;;  %v59_v2 = vld [vmem:[#allocation2 + $0x28] sm:$0xff]  ;;  %vm217_vm0 = vcmask 1040384   ;;  %vm246_vm1 = vcmask 261120  }
  0x38   :  { %v54_v1 = vld [vmem:[#allocation2] sm:$0xff]  ;;  %102 = vxpose.xlu1.b32.start [1/4] (short) (narrow) %v58_v0, 16  ;;  %v55_v3 = vld [vmem:[#allocation2 + $0x8] sm:$0xff]  ;;  %v60_v4 = vld [vmem:[#allocation2 + $0x30] sm:$0xff]  ;;  %vm249_vm2 = vcmask 253952   ;;  %s384_s2 = smov [#allocation8]  }
  0x39   :  { %70 = vxpose.xlu0.b32.start [1/4] (short) (narrow) %v54_v1, 16  ;;  %v56_v5 = vld [vmem:[#allocation2 + $0x10] sm:$0xff]  ;;  %v61_v6 = vld [vmem:[#allocation2 + $0x38] sm:$0xff]  ;;  %v66_v8 = vld [vmem:[#allocation2 + $0x60] sm:$0xff]  ;;  %s265_s22 = sshll.u32 %s384_s2, 4  ;;  %s266_s22 = int_to_ptr.vmem [resolvable:$true] %s265_s22 }
  0x3a   :  { %v57_v7 = vld [vmem:[#allocation2 + $0x18] sm:$0xff]  ;;  %v62_v9 = vld [vmem:[#allocation2 + $0x40] sm:$0xff]  ;;  %v67_v10 = vld [vmem:[#allocation2 + $0x68] sm:$0xff]  ;;  %s351_s23 = scalar_lea.vmem %s266_s22, 1536  ;;  %p356_p11 = scmp.lt.s32.totalorder %s266_s22, %s266_s22 }
  0x3b   :  { %v63_v11 = vld [vmem:[#allocation2 + $0x48] sm:$0xff]  ;;  %v68_v12 = vld [vmem:[#allocation2 + $0x70] sm:$0xff]  ;;  %v69_v14 = vld [vmem:[#allocation2 + $0x78] sm:$0xff]  ;;  %p352_p10 = scmp.ne.s32.totalorder %s266_s22, %s351_s23  ;;  %p357_p12 = scmp.lt.s32.totalorder %s351_s23, %s351_s23 }
  0x3c   :  { %103 = vxpose.xlu1.b32.cont [2/4] (short) (narrow) %v59_v2, 16  ;;  %v64_v13 = vld [vmem:[#allocation2 + $0x50] sm:$0xff]  ;;  %v65_v15 = vld [vmem:[#allocation2 + $0x58] sm:$0xff]  ;;  %v198_v16 = vld [vmem:[#allocation7] sm:$0xff] }
  0x3d   :  { %71 = vxpose.xlu0.b32.cont [2/4] (short) (narrow) %v55_v3, 16  ;;  %v208_v21 = vld [vmem:[#allocation5] sm:$0x1]  ;;  %v199_v22 = vld [vmem:[#allocation7 + $0x8] sm:$0xff]  ;;  %p358_p13 = por %p357_p12, %p356_p11 }
  0x3f   :  { %p359_p0 = pnand %p358_p13, %p352_p10 }
  0x40   :  { %104 = vxpose.xlu1.b32.cont [3/4] (short) (narrow) %v60_v4, 16 }
  0x41   :  { %72 = vxpose.xlu0.b32.cont [3/4] (short) (narrow) %v56_v5, 16 }
  0x44   :  { %105 = vxpose.xlu1.b32.end [4/4] (short) (narrow) %v61_v6, 16 }
  0x45   :  { %73 = vxpose.xlu0.b32.end [4/4] (short) (narrow) %v57_v7, 16 }
  0x48   :  { %166 = vxpose.xlu1.b32.start [1/4] (short) (narrow) %v66_v8, 16 }
  0x49   :  { %134 = vxpose.xlu0.b32.start [1/4] (short) (narrow) %v62_v9, 16 }
  0x4c   :  { %167 = vxpose.xlu1.b32.cont [2/4] (short) (narrow) %v67_v10, 16 }
  0x4d   :  { %135 = vxpose.xlu0.b32.cont [2/4] (short) (narrow) %v63_v11, 16 }
  0x50   :  { %168 = vxpose.xlu1.b32.cont [3/4] (short) (narrow) %v68_v12, 16 }
  0x51   :  { %136 = vxpose.xlu0.b32.cont [3/4] (short) (narrow) %v64_v13, 16 }
  0x54   :  { %169 = vxpose.xlu1.b32.end [4/4] (short) (narrow) %v69_v14, 16 }
  0x55   :  { %137 = vxpose.xlu0.b32.end [4/4] (short) (narrow) %v65_v15, 16 }
  0xb8   :  { %v118_v17 = vpop.trf.xlu1 }
  0xb9   :  { %v86_v18 = vpop.trf.xlu0  ;;  %v202_v19 = vadd.f32 %v198_v16, %v118_v17 }
  0xba   :  { %v200_v20 = vadd.f32 %v198_v16, %v86_v18 }
  0xbb   :  { %v221_v23 = vrot.slane %v202_v19, 7 }
  0xbc   :  { %v218_v24 = vrot.slane %v200_v20, 7  ;;  %v119_v25 = vpop.trf.xlu1 }
  0xbd   :  { %v87_v26 = vpop.trf.xlu0  ;;  %v243_v27 = vsel %vm217_vm0, %v208_v21, %v221_v23  ;;  %v203_v29 = vadd.f32 %v199_v22, %v119_v25 }
  0xbe   :  { %v242_v28 = vsel %vm217_vm0, %v208_v21, %v218_v24  ;;  %v201_v30 = vadd.f32 %v199_v22, %v87_v26  ;;  %251 = vst.msk [vmem:[#allocation8 + $0x18] sm:$0xff] %vm246_vm1, %v243_v27 }
  0xbf   :  { %247 = vst.msk [vmem:[#allocation8] sm:$0xff] %vm246_vm1, %v242_v28  ;;  %v222_v31 = vrot.slane %v203_v29, 7 }
  0xc0   :  { %v219_v32 = vrot.slane %v201_v30, 7 }
  0xc1   :  { %v223_v33 = vsel %vm217_vm0, %v221_v23, %v222_v31  ;;  %253 = vst.msk [vmem:[#allocation8 + $0x28] sm:$0x1] %vm249_vm2, %v222_v31 }
  0xc2   :  { %v220_v34 = vsel %vm217_vm0, %v218_v24, %v219_v32  ;;  %250 = vst.msk [vmem:[#allocation8 + $0x10] sm:$0x1] %vm249_vm2, %v219_v32 }
  0xc3   :  { %252 = vst.msk [vmem:[#allocation8 + $0x20] sm:$0xff] %vm246_vm1, %v223_v33  ;;  %248 = vst.msk [vmem:[#allocation8 + $0x8] sm:$0xff] %vm246_vm1, %v220_v34 }
  0xc8   :  { %v182_v35 = vpop.trf.xlu1 }
  0xc9   :  { %v150_v36 = vpop.trf.xlu0  ;;  %v206_v37 = vadd.f32 %v198_v16, %v182_v35 }
  0xca   :  { %v204_v38 = vadd.f32 %v198_v16, %v150_v36 }
  0xcb   :  { %v227_v39 = vrot.slane %v206_v37, 7 }
  0xcc   :  { %v224_v40 = vrot.slane %v204_v38, 7  ;;  %v183_v41 = vpop.trf.xlu1 }
  0xcd   :  { %v151_v42 = vpop.trf.xlu0  ;;  %v245_v43 = vsel %vm217_vm0, %v208_v21, %v227_v39  ;;  %v207_v45 = vadd.f32 %v199_v22, %v183_v41 }
  0xce   :  { %v244_v44 = vsel %vm217_vm0, %v208_v21, %v224_v40  ;;  %v205_v46 = vadd.f32 %v199_v22, %v151_v42  ;;  %257 = vst.msk [vmem:[#allocation8 + $0x48] sm:$0xff] %vm246_vm1, %v245_v43 }
  0xcf   :  { %254 = vst.msk [vmem:[#allocation8 + $0x30] sm:$0xff] %vm246_vm1, %v244_v44  ;;  %v228_v47 = vrot.slane %v207_v45, 7 }
  0xd0   :  { %v225_v48 = vrot.slane %v205_v46, 7 }
  0xd1   :  { %v229_v49 = vsel %vm217_vm0, %v227_v39, %v228_v47  ;;  %259 = vst.msk [vmem:[#allocation8 + $0x58] sm:$0x1] %vm249_vm2, %v228_v47 }
  0xd2   :  { %v226_v50 = vsel %vm217_vm0, %v224_v40, %v225_v48  ;;  %256 = vst.msk [vmem:[#allocation8 + $0x40] sm:$0x1] %vm249_vm2, %v225_v48 }
  0xd3   :  { %258 = vst.msk [vmem:[#allocation8 + $0x50] sm:$0xff] %vm246_vm1, %v229_v49  ;;  %255 = vst.msk [vmem:[#allocation8 + $0x38] sm:$0xff] %vm246_vm1, %v226_v50 }
  0xd4   :  { %362 = shalt.err (!%p359_p0)
}
  0xd5   :  { %s363_s26 = scalar_lea.hbm %s492_s3, 1536 }
  0xd6   :  { %p364_p1 = scmp.ne.s32.totalorder %s492_s3, %s363_s26  ;;  %p367_p2 = scmp.lt.u32.totalorder %s363_s26, %s492_s3 }
  0xd8   :  { %p369_p3 = pnand %p367_p2, %p364_p1 }
  0xda   :  { %372 = shalt.err (!%p369_p3)
}
  0xdb   :  { %271 = dma.vmem_to_hbm [thread:$0]  %s266_s22, 1536, %s492_s3, [#allocation4], %s381_s1, %s381_s1, %s382_s8  }
  0xdc   :  { %377 = dma.done.wait [#allocation4], 1536  }
  0xdd   :  { %378 = vsyncadd [#allocation4], 4294965760 }
  0xde   :  { %275 = vsyncpa [#allocation3], 1 }
  0xdf   :  { %276 = vsyncpa [#allocation6], 1 }
  0xe0   :  { %277 = vsyncpa [#allocation4], 1 }

</bundles_post_ra>
